<compile_context>
chip_gen: v5e
topology: v5e:2x2
jax: 0.10.0
libtpu: 0.0.40
codegen_flags: <defaults>
</compile_context>

<pallas_src>
import jax
import jax.numpy as jnp
from jax.experimental import pallas as pl
from jax.experimental.pallas import tpu as pltpu


def _round_up(x, m):
    return (x + m - 1) // m * m


def _cdiv(a, b):
    return (a + b - 1) // b


def _vmem_capacity_bytes():
    """Generation-aware VMEM capacity; conservative fallback = 64 MiB (v7x per-TC)."""
    try:
        info = pltpu.get_tpu_info()
        cap = getattr(info, "vmem_capacity_bytes", None)
        if cap:
            return int(cap)
    except Exception:
        pass
    return 64 * 1024 * 1024


def _const_spec(shape, index_map):
    """Constant-index operand: single-buffer it (double-buffering wastes VMEM)."""
    if hasattr(pl, "Buffered"):
        try:
            return pl.BlockSpec(shape, index_map, pipeline_mode=pl.Buffered(1))
        except TypeError:
            pass
    return pl.BlockSpec(shape, index_map)


def mvfc_kernel(x_ref, w1_ref, b1_ref, w2_ref, b2_ref, o_ref):
    # x: (tm, V*F). BN-point, Linear1 bias and BN1d are pre-folded into W1/b1.
    h = jnp.dot(x_ref[...], w1_ref[...], preferred_element_type=jnp.float32)
    h = jnp.maximum(h + b1_ref[...], 0.0)                  # f32 epilogue (v5e-safe)
    o = jnp.dot(h.astype(w2_ref.dtype), w2_ref[...],
                preferred_element_type=jnp.float32)
    o_ref[...] = (o + b2_ref[...]).astype(o_ref.dtype)


def fold_params(raw, num_views, eps=1e-5):
    """Fold eval-mode BatchNorms + Linear1 bias into (W1', b1', W2, b2), in f32."""
    (g1, be1, rm1, rv1, w1, lb1, g2, be2, rm2, rv2, w2, lb2) = raw
    V = num_views
    # BatchNormPoint(F) (eval) as per-feature affine, tiled across the V views
    # of the flattened (B, V*F) layout (flat index j = v*F + f).
    s1 = g1 / jnp.sqrt(rv1 + eps)
    b1 = be1 - rm1 * s1
    s1t = jnp.tile(s1, V)                                  # (V*F,)
    b1t = jnp.tile(b1, V)                                  # (V*F,)
    # BatchNorm1d(F) (eval) as per-feature affine.
    s2 = g2 / jnp.sqrt(rv2 + eps)
    b2 = be2 - rm2 * s2
    # (x*s1 + b1) @ W1 + lb1, then *s2 + b2  ==  x @ W1f + b1f
    w1f = (s1t[:, None] * w1) * s2[None, :]
    b1f = (b1t @ w1 + lb1) * s2 + b2
    return w1f, b1f.reshape(1, -1), w2, lb2.reshape(1, -1)


def mvfc_forward(feat, raw_params, num_views, in_features, *,
                 tm=1024, use_bf16=True, eps=1e-5):
    V, F = num_views, in_features
    VF = V * F

    mm_dtype = jnp.bfloat16 if use_bf16 else jnp.float32
    in_itemsize = 2 if use_bf16 else 4
    out_itemsize = in_itemsize

    # Single pass over the activation: reshape (free) + one cast to mm_dtype.
    x_in = feat.reshape(-1, VF).astype(mm_dtype)
    B = x_in.shape[0]

    # Fold BN affines + Linear1 bias (f32), then pad F / O to lane-dense 128.
    w1f, b1f, w2f, b2f = fold_params(raw_params, V, eps)
    O = w2f.shape[1]
    F_pad = _round_up(F, 128)
    O_pad = _round_up(O, 128)
    if F_pad != F:
        w1f = jnp.pad(w1f, ((0, 0), (0, F_pad - F)))
        b1f = jnp.pad(b1f, ((0, 0), (0, F_pad - F)))
        w2f = jnp.pad(w2f, ((0, F_pad - F), (0, 0)))
    if O_pad != O:
        w2f = jnp.pad(w2f, ((0, 0), (0, O_pad - O)))
        b2f = jnp.pad(b2f, ((0, 0), (0, O_pad - O)))

    w1_in = w1f.astype(mm_dtype)
    w2_in = w2f.astype(mm_dtype)
    b1_in = b1f.astype(jnp.float32)
    b2_in = b2f.astype(jnp.float32)

    # Batch tile: large (amortizes per-step overhead), 16-row aligned (bf16
    # sublane packing), no larger than the batch.
    tm_eff = max(16, _round_up(min(tm, _round_up(B, 16)), 16))
    # v7x has 2 TensorCores: split big batches into >=4 grid steps so the
    # "parallel" axis actually shards (harmless on v5e/v6e), but keep tiles
    # at >=256 rows.
    if B >= 512:
        tm_eff = min(tm_eff, max(256, _round_up(_cdiv(B, 4), 16)))

    vmem_cap = _vmem_capacity_bytes()
    budget = int(vmem_cap * 0.70)

    def vmem_est(t):
        return (2 * t * VF * in_itemsize                     # x tile (double-buffered)
                + 2 * t * O_pad * out_itemsize               # out tile (double-buffered)
                + (VF * F_pad + F_pad * O_pad) * in_itemsize  # weights (single-buffered)
                + (F_pad + O_pad) * 4                        # biases
                + 2 * t * F_pad * 4)                         # f32 h / compute headroom

    while tm_eff > 16 and vmem_est(tm_eff) > budget:
        tm_eff = max(16, _round_up(tm_eff // 2, 16))

    grid = (_cdiv(B, tm_eff),)
    vmem_limit = int(min(max(2 * vmem_est(tm_eff), 32 * 1024 * 1024),
                         int(vmem_cap * 0.9)))

    out = pl.pallas_call(
        mvfc_kernel,
        out_shape=jax.ShapeDtypeStruct((B, O_pad), mm_dtype),
        grid=grid,
        in_specs=[
            pl.BlockSpec((tm_eff, VF), lambda i: (i, 0)),     # x tile (pipelined)
            _const_spec((VF, F_pad), lambda i: (0, 0)),       # folded W1 (resident)
            _const_spec((1, F_pad), lambda i: (0, 0)),        # folded bias1
            _const_spec((F_pad, O_pad), lambda i: (0, 0)),    # W2 (lane-dense)
            _const_spec((1, O_pad), lambda i: (0, 0)),        # bias2
        ],
        out_specs=pl.BlockSpec((tm_eff, O_pad), lambda i: (i, 0)),
        compiler_params=pltpu.CompilerParams(
            dimension_semantics=("parallel",),
            vmem_limit_bytes=vmem_limit,
        ),
    )(x_in, w1_in, b1_in, w2_in, b2_in)

    # Padded output cols sliced off; tiny (B, O) slice cast back to input dtype.
    return out[:, :O].astype(feat.dtype)


def make_params(key, num_views, in_features, out_features):
    """Deterministic synthetic parameters matching the PyTorch module's shapes."""
    V, F, O = num_views, in_features, out_features
    ks = jax.random.split(key, 12)
    # BatchNormPoint(F): gamma, beta, running_mean, running_var
    g1 = 1.0 + 0.1 * jax.random.normal(ks[0], (F,), jnp.float32)
    be1 = 0.1 * jax.random.normal(ks[1], (F,), jnp.float32)
    rm1 = 0.05 * jax.random.normal(ks[2], (F,), jnp.float32)
    rv1 = 1.0 + 0.1 * jax.random.uniform(ks[3], (F,), jnp.float32)
    # Linear(V*F -> F), stored as (V*F, F)
    w1 = 0.05 * jax.random.normal(ks[4], (V * F, F), jnp.float32)
    lb1 = 0.05 * jax.random.normal(ks[5], (F,), jnp.float32)
    # BatchNorm1d(F)
    g2 = 1.0 + 0.1 * jax.random.normal(ks[6], (F,), jnp.float32)
    be2 = 0.1 * jax.random.normal(ks[7], (F,), jnp.float32)
    rm2 = 0.05 * jax.random.normal(ks[8], (F,), jnp.float32)
    rv2 = 1.0 + 0.1 * jax.random.uniform(ks[9], (F,), jnp.float32)
    # Linear(F -> O), stored as (F, O)
    w2 = 0.05 * jax.random.normal(ks[10], (F, O), jnp.float32)
    lb2 = 0.05 * jax.random.normal(ks[11], (O,), jnp.float32)
    return (g1, be1, rm1, rv1, w1, lb1, g2, be2, rm2, rv2, w2, lb2)


def mvfc_ref(feat, raw, num_views, in_features, eps=1e-5):
    """Pure-JAX f32 reference of the eval-mode forward pass (unfolded)."""
    V, F = num_views, in_features
    (g1, be1, rm1, rv1, w1, lb1, g2, be2, rm2, rv2, w2, lb2) = raw
    x = feat.reshape(-1, V, F).astype(jnp.float32)
    h = (x - rm1) / jnp.sqrt(rv1 + eps) * g1 + be1        # BatchNormPoint (eval)
    h = h.reshape(-1, V * F)                              # Flatten
    h = h @ w1 + lb1                                      # Linear(V*F -> F)
    h = (h - rm2) / jnp.sqrt(rv2 + eps) * g2 + be2        # BatchNorm1d (eval)
    h = jnp.maximum(h, 0.0)                               # ReLU
    return h @ w2 + lb2                                   # Linear(F -> O)


if __name__ == "__main__":
    num_views, in_features, out_features = 4, 32, 16
    B = 8

    key = jax.random.PRNGKey(0)
    k_feat, k_par = jax.random.split(key)
    feat = jax.random.normal(k_feat, (B, num_views, in_features), jnp.float32)
    raw = make_params(k_par, num_views, in_features, out_features)

    ref = mvfc_ref(feat, raw, num_views, in_features)

    # Default fast path: bf16 matmul operands + bf16 output, f32 MXU accumulation.
    out = jax.block_until_ready(mvfc_forward(feat, raw, num_views, in_features))
    assert out.shape == (B, out_features)
    assert jnp.allclose(out, ref, atol=2e-2, rtol=2e-2), "bf16 path mismatch vs reference"

    # f32-operand path should match tightly.
    out_f32 = jax.block_until_ready(
        mvfc_forward(feat, raw, num_views, in_features, use_bf16=False))
    assert out_f32.shape == (B, out_features)
    assert jnp.allclose(out_f32, ref, atol=2e-3, rtol=2e-3), "f32 path mismatch vs reference"

    print("KERNEL_OK")
</pallas_src>

<mosaic_0001>
module attributes {stable_mosaic.version = 11 : i64} {
  func.func @mvfc_kernel(%arg0: i32, %arg1: memref<16x128xbf16, #tpu.memory_space<vmem>>, %arg2: memref<128x128xbf16, #tpu.memory_space<vmem>>, %arg3: memref<1x128xf32, #tpu.memory_space<vmem>>, %arg4: memref<128x128xbf16, #tpu.memory_space<vmem>>, %arg5: memref<1x128xf32, #tpu.memory_space<vmem>>, %arg6: memref<16x128xbf16, #tpu.memory_space<vmem>>) attributes {dimension_semantics = [#tpu.dimension_semantics<parallel>], iteration_bounds = array<i64: 1>, scalar_prefetch = 0 : i64, scratch_operands = 0 : i64, tpu.core_type = #tpu.core_type<tc>, window_params = [{transform_indices = @transform_0, window_bounds = array<i64: 16, 128>}, {pipeline_mode = #tpu.pipeline_mode<synchronous>, transform_indices = @transform_1, window_bounds = array<i64: 128, 128>}, {pipeline_mode = #tpu.pipeline_mode<synchronous>, transform_indices = @transform_2, window_bounds = array<i64: 1, 128>}, {pipeline_mode = #tpu.pipeline_mode<synchronous>, transform_indices = @transform_3, window_bounds = array<i64: 128, 128>}, {pipeline_mode = #tpu.pipeline_mode<synchronous>, transform_indices = @transform_4, window_bounds = array<i64: 1, 128>}, {transform_indices = @transform_5, window_bounds = array<i64: 16, 128>}]} {
    %c0 = arith.constant 0 : index
    %c0_0 = arith.constant 0 : index
    %0 = vector.load %arg1[%c0, %c0_0] : memref<16x128xbf16, #tpu.memory_space<vmem>>, vector<16x128xbf16>
    %c0_1 = arith.constant 0 : index
    %c0_2 = arith.constant 0 : index
    %1 = vector.load %arg2[%c0_1, %c0_2] : memref<128x128xbf16, #tpu.memory_space<vmem>>, vector<128x128xbf16>
    %cst = arith.constant dense<0.000000e+00> : vector<16x128xf32>
    %2 = tpu.matmul %0, %1, %cst {dimension_numbers = #tpu.dot_dimension_numbers<[1], [0], [0], [1], [0, 0, 1, 1], [], []>} : vector<16x128xbf16>, vector<128x128xbf16>, vector<16x128xf32> -> vector<16x128xf32>
    %c0_3 = arith.constant 0 : index
    %c0_4 = arith.constant 0 : index
    %3 = vector.load %arg3[%c0_3, %c0_4] : memref<1x128xf32, #tpu.memory_space<vmem>>, vector<1x128xf32>
    %4 = vector.broadcast %3 : vector<1x128xf32> to vector<16x128xf32>
    %5 = arith.addf %2, %4 : vector<16x128xf32>
    %cst_5 = arith.constant 0.000000e+00 : f32
    %6 = vector.broadcast %cst_5 : f32 to vector<16x128xf32>
    %7 = arith.maximumf %5, %6 : vector<16x128xf32>
    %8 = arith.truncf %7 : vector<16x128xf32> to vector<16x128xbf16>
    %c0_6 = arith.constant 0 : index
    %c0_7 = arith.constant 0 : index
    %9 = vector.load %arg4[%c0_6, %c0_7] : memref<128x128xbf16, #tpu.memory_space<vmem>>, vector<128x128xbf16>
    %cst_8 = arith.constant dense<0.000000e+00> : vector<16x128xf32>
    %10 = tpu.matmul %8, %9, %cst_8 {dimension_numbers = #tpu.dot_dimension_numbers<[1], [0], [0], [1], [0, 0, 1, 1], [], []>} : vector<16x128xbf16>, vector<128x128xbf16>, vector<16x128xf32> -> vector<16x128xf32>
    %c0_9 = arith.constant 0 : index
    %c0_10 = arith.constant 0 : index
    %11 = vector.load %arg5[%c0_9, %c0_10] : memref<1x128xf32, #tpu.memory_space<vmem>>, vector<1x128xf32>
    %12 = vector.broadcast %11 : vector<1x128xf32> to vector<16x128xf32>
    %13 = arith.addf %10, %12 : vector<16x128xf32>
    %14 = arith.truncf %13 : vector<16x128xf32> to vector<16x128xbf16>
    %c0_11 = arith.constant 0 : index
    %c0_12 = arith.constant 0 : index
    %15 = vector.load %arg6[%c0_11, %c0_12] : memref<16x128xbf16, #tpu.memory_space<vmem>>, vector<16x128xbf16>
    tpu.vector_store %arg6[%c0_11, %c0_12], %14 {strides = array<i32>} : memref<16x128xbf16, #tpu.memory_space<vmem>>, vector<16x128xbf16>,
    return
  }
  func.func @transform_0(%arg0: i32) -> (i32, i32) {
    %c0_i32 = arith.constant 0 : i32
    %c0_i32_0 = arith.constant 0 : i32
    return %arg0, %c0_i32 : i32, i32
  }
  func.func @transform_1(%arg0: i32) -> (i32, i32) {
    %c0_i32 = arith.constant 0 : i32
    %c0_i32_0 = arith.constant 0 : i32
    %c0_i32_1 = arith.constant 0 : i32
    return %c0_i32, %c0_i32_0 : i32, i32
  }
  func.func @transform_2(%arg0: i32) -> (i32, i32) {
    %c0_i32 = arith.constant 0 : i32
    %c0_i32_0 = arith.constant 0 : i32
    %c0_i32_1 = arith.constant 0 : i32
    return %c0_i32, %c0_i32_0 : i32, i32
  }
  func.func @transform_3(%arg0: i32) -> (i32, i32) {
    %c0_i32 = arith.constant 0 : i32
    %c0_i32_0 = arith.constant 0 : i32
    %c0_i32_1 = arith.constant 0 : i32
    return %c0_i32, %c0_i32_0 : i32, i32
  }
  func.func @transform_4(%arg0: i32) -> (i32, i32) {
    %c0_i32 = arith.constant 0 : i32
    %c0_i32_0 = arith.constant 0 : i32
    %c0_i32_1 = arith.constant 0 : i32
    return %c0_i32, %c0_i32_0 : i32, i32
  }
  func.func @transform_5(%arg0: i32) -> (i32, i32) {
    %c0_i32 = arith.constant 0 : i32
    %c0_i32_0 = arith.constant 0 : i32
    return %arg0, %c0_i32 : i32, i32
  }
}

</mosaic_0001>

<bundles_post_ra>
// kernel: tpu_custom_call.1
= control target key start
LH: loop header
LB: loop body
LE: loop exit
PB: predicated region body
PF: predicated region fallthrough
CT: control target
= control target key end

     0   :  { %10 = vsyncpa [#allocation3], 0  ;;  %s533_s0 = inlined_call_operand.hbm [shape: bf16[8,128], index: 0, kind: input, shape index: {}]   ;;  %s534_s1 = inlined_call_operand.hbm [shape: bf16[128,128], index: 1, kind: input, shape index: {}]   ;;  %s535_s2 = inlined_call_operand.vmem [shape: f32[1,128], index: 2, kind: input, shape index: {}]   ;;  %s536_s3 = inlined_call_operand.hbm [shape: bf16[128,128], index: 3, kind: input, shape index: {}]   ;;  %s537_s4 = inlined_call_operand.vmem [shape: f32[1,128], index: 4, kind: input, shape index: {}]   ;;  %s538_s5 = inlined_call_operand.hbm [shape: bf16[8,128], index: 5, kind: output, shape index: {}]  }
   0x1   :  { %11 = vsyncpa [#allocation6], 0 }
   0x2   :  { %12 = vsyncpa [#allocation4], 0 }
   0x3   :  { %16 = vsyncadd [#allocation3], 64  ;;  %s30_s20 = sshll.u32 %s534_s1, 4  ;;  %s467_s21 = smov [#allocation5]   ;;  %s31_s20 = int_to_ptr.hbm [resolvable:$true] %s30_s20 }
   0x4   :  { %s32_s22 = sshll.u32 %s467_s21, 4  ;;  %s17_s25 = sshll.u32 %s533_s0, 4  ;;  %s33_s22 = int_to_ptr.vmem [resolvable:$true] %s32_s22  ;;  %s18_s25 = int_to_ptr.hbm [resolvable:$true] %s17_s25 }
   0x5   :  { %s468_s26 = smov 64   ;;  %s469_s27 = smov 4  }
   0x6   :  { %38 = dma.hbm_to_vmem [thread:$0]  %s31_s20, 1024, %s33_s22, [#allocation6], %s468_s26, %s468_s26, %s469_s27  }
   0x7   :  { %s470_s28 = smov [#allocation2]   ;;  %s45_s1 = sshll.u32 %s536_s3, 4  ;;  %s46_s1 = int_to_ptr.hbm [resolvable:$true] %s45_s1 }
   0x8   :  { %s19_s29 = sshll.u32 %s470_s28, 4  ;;  %s471_s0 = smov [#allocation7]   ;;  %s20_s29 = int_to_ptr.vmem [resolvable:$true] %s19_s29 }
   0x9   :  { %25 = dma.hbm_to_vmem [thread:$0]  %s18_s25, 64, %s20_s29, [#allocation3], %s468_s26, %s468_s26, %s469_s27  }
   0xa   :  { %s47_s7 = sshll.u32 %s471_s0, 4  ;;  %s48_s7 = int_to_ptr.vmem [resolvable:$true] %s47_s7 }
   0xb   :  { %53 = dma.hbm_to_vmem [thread:$0]  %s46_s1, 1024, %s48_s7, [#allocation6], %s468_s26, %s468_s26, %s469_s27  }
   0xc   :  { %461 = dma.done.wait [#allocation3], 128  }
   0xd   :  { %462 = vsyncadd [#allocation3], 4294967168 }
   0xe   :  { %463 = dma.done.wait [#allocation6], 2048  }
   0xf   :  { %464 = vsyncadd [#allocation6], 4294965248  ;;  %v343_v0 = vld [vmem:[#allocation5 + $0x38] sm:$0xff]  ;;  %v342_v1 = vld [vmem:[#allocation5 + $0x30] sm:$0xff] }
  0x10   :  { %144 = vmatpush.bf16.msra.mxu0 %v343_v0  ;;  %v351_v2 = vld [vmem:[#allocation7 + $0x38] sm:$0xff]  ;;  %v350_v3 = vld [vmem:[#allocation7 + $0x30] sm:$0xff]  ;;  %v341_v4 = vld [vmem:[#allocation5 + $0x28] sm:$0xff] }
  0x11   :  { %229 = vmatpush.bf16.msra.mxu1 %v351_v2  ;;  %v349_v5 = vld [vmem:[#allocation7 + $0x28] sm:$0xff]  ;;  %v340_v6 = vld [vmem:[#allocation5 + $0x20] sm:$0xff]  ;;  %v339_v8 = vld [vmem:[#allocation5 + $0x18] sm:$0xff] }
  0x12   :  { %v348_v7 = vld [vmem:[#allocation7 + $0x20] sm:$0xff]  ;;  %v338_v9 = vld [vmem:[#allocation5 + $0x10] sm:$0xff]  ;;  %v337_v10 = vld [vmem:[#allocation5 + $0x8] sm:$0xff] }
  0x13   :  { %v336_v11 = vld [vmem:[#allocation5] sm:$0xff]  ;;  %v335_v12 = vld [vmem:[#allocation2] sm:$0xff]  ;;  %v346_v14 = vld [vmem:[#allocation7 + $0x10] sm:$0xff] }
  0x14   :  { %145 = vmatpush.bf16.msra.mxu0 %v342_v1  ;;  %v347_v13 = vld [vmem:[#allocation7 + $0x18] sm:$0xff]  ;;  %v345_v15 = vld [vmem:[#allocation7 + $0x8] sm:$0xff]  ;;  %v344_v16 = vld [vmem:[#allocation7] sm:$0xff] }
  0x15   :  { %230 = vmatpush.bf16.msra.mxu1 %v350_v3  ;;  %v363_v18 = vld [vmem:[%s535_s2] ss:$0 sm:$0xff] }
  0x16   :  { %v364_v26 = vld [vmem:[%s537_s4] ss:$0 sm:$0xff] }
  0x18   :  { %146 = vmatpush.bf16.msra.mxu0 %v341_v4 }
  0x19   :  { %231 = vmatpush.bf16.msra.mxu1 %v349_v5 }
  0x1c   :  { %147 = vmatpush.bf16.msra.mxu0 %v340_v6 }
  0x1d   :  { %232 = vmatpush.bf16.msra.mxu1 %v348_v7 }
  0x20   :  { %148 = vmatpush.bf16.msra.mxu0 %v339_v8 }
  0x21   :  { %233 = vmatpush.bf16.msra.mxu1 %v347_v13 }
  0x24   :  { %149 = vmatpush.bf16.msra.mxu0 %v338_v9 }
  0x25   :  { %234 = vmatpush.bf16.msra.mxu1 %v346_v14 }
  0x28   :  { %150 = vmatpush.bf16.msra.mxu0 %v337_v10 }
  0x29   :  { %235 = vmatpush.bf16.msra.mxu1 %v345_v15 }
  0x2c   :  { %151 = vmatpush.bf16.msra.mxu0 %v336_v11 }
  0x2d   :  { %236 = vmatpush.bf16.msra.mxu1 %v344_v16 }
  0x2f   :  { %152 = vmatmul.bf16.vlgmr.msra.gmra.mxu0 %v335_v12 }
  0xac   :  { %v153_v17 = vpop.f32.mrf.mxu0 }
  0xad   :  { %v154_v19 = vadd.f32 %v363_v18, %v153_v17 }
  0xaf   :  { %v158_v22 = vmax.f32 %v154_v19, 0.0 }
  0xb4   :  { %v155_v20 = vpop.f32.mrf.mxu0 }
  0xb5   :  { %v156_v21 = vadd.f32 %v363_v18, %v155_v20 }
  0xb7   :  { %v159_v23 = vmax.f32 %v156_v21, 0.0 }
  0xb9   :  { %v160_v24 = vpack.c.bf16 %v159_v23, %v158_v22 }
  0xbb   :  { %237 = vmatmul.bf16.vlgmr.msra.gmra.mxu1 %v160_v24 }
 0x138   :  { %v238_v25 = vpop.f32.mrf.mxu1 }
 0x139   :  { %v239_v28 = vadd.f32 %v364_v26, %v238_v25 }
 0x140   :  { %v240_v27 = vpop.f32.mrf.mxu1 }
 0x141   :  { %v241_v29 = vadd.f32 %v364_v26, %v240_v27 }
 0x143   :  { %v355_v30 = vpack.c.bf16 %v241_v29, %v239_v28 }
 0x145   :  { %356 = vst [vmem:[#allocation8] sm:$0xff] %v355_v30  }
 0x146   :  { %250 = vsyncadd [#allocation4], 64  ;;  %s253_s12 = sshll.u32 %s538_s5, 4  ;;  %s472_s13 = smov [#allocation8]   ;;  %s254_s12 = int_to_ptr.hbm [resolvable:$true] %s253_s12 }
 0x147   :  { %s251_s14 = sshll.u32 %s472_s13, 4  ;;  %s252_s14 = int_to_ptr.vmem [resolvable:$true] %s251_s14 }
 0x148   :  { %259 = dma.vmem_to_hbm [thread:$0]  %s252_s14, 64, %s254_s12, [#allocation4], %s468_s26, %s468_s26, %s469_s27  }
 0x149   :  { %465 = dma.done.wait [#allocation4], 128  }
 0x14a   :  { %466 = vsyncadd [#allocation4], 4294967168 }
 0x14b   :  { %264 = vsyncpa [#allocation3], 1 }
 0x14c   :  { %265 = vsyncpa [#allocation6], 1 }
 0x14d   :  { %266 = vsyncpa [#allocation4], 1 }

</bundles_post_ra>
